<compile_context>
chip_gen: v7x
topology: tpu7x:2x2x1
jax: 0.10.0
libtpu: 0.0.40
codegen_flags: <defaults>
</compile_context>

<pallas_src>
import jax
import jax.numpy as jnp
from jax.experimental import pallas as pl
from jax.experimental.pallas import tpu as pltpu


def _round_up(x, m):
    return ((x + m - 1) // m) * m


def _text_rnn_kernel(x_ref, h0_ref, wih_ref, whh_ref, brnn_ref,
                     wfc_ref, bfc_ref, out_ref):
    """RNN recurrence + final Linear, fully inside one kernel invocation.

    x_ref   : [seq * batch_pad, in_pad]   bf16, time-major, batch & lane padded
    h0_ref  : [batch_pad, hid_pad]        f32
    wih_ref : [in_pad, hid_pad]           bf16 (= W_ih^T, zero-padded)
    whh_ref : [hid_pad, hid_pad]          bf16 (= W_hh^T, zero-padded)
    brnn_ref: [1, hid_pad]                f32  (= b_ih + b_hh, zero-padded)
    wfc_ref : [hid_pad, cls_pad]          bf16 (= W_fc^T, zero-padded)
    bfc_ref : [1, cls_pad]                f32
    out_ref : [batch_pad, cls_pad]        f32
    """
    bp = h0_ref.shape[0]
    seq_len = x_ref.shape[0] // bp

    # Hoisted input projection: one bf16 MXU matmul with f32 accumulation plus
    # fused bias, kept as a vreg-resident value (no VMEM scratch round trip).
    xw = (
        jnp.dot(x_ref[...], wih_ref[...], preferred_element_type=jnp.float32)
        + brnn_ref[...]
    )

    whh = whh_ref[...]                       # bf16, loaded once
    h = h0_ref[...].astype(jnp.float32)      # recurrent state kept in f32

    # Fully unrolled serial recurrence: one single-pass bf16 MXU push + one f32
    # tanh (EUP) per step; static slices of the vreg-resident projection.
    for t in range(seq_len):
        xw_t = xw[t * bp:(t + 1) * bp, :]
        h = jnp.tanh(
            xw_t + jnp.dot(h.astype(jnp.bfloat16), whh,
                           preferred_element_type=jnp.float32))

    # Final Linear on the last hidden state; lane-dense [bp, cls_pad] store.
    out_ref[...] = (
        jnp.dot(h.astype(jnp.bfloat16), wfc_ref[...],
                preferred_element_type=jnp.float32)
        + bfc_ref[...]
    ).astype(out_ref.dtype)


def prepare_text_rnn_params(params):
    """One-time weight prep (pad, transpose, fuse biases, cast MXU operands).

    Hoisted out of the per-call path: the kernel is launch-bound, so doing this
    glue once instead of per forward is a real end-to-end win.
    """
    w_ih, w_hh, b_ih, b_hh, w_fc, b_fc = (
        params["w_ih"], params["w_hh"], params["b_ih"],
        params["b_hh"], params["w_fc"], params["b_fc"])

    n_hidden, n_class = w_ih.shape
    hp = _round_up(n_hidden, 128)     # lane multiple for hidden dim
    ip = _round_up(n_class, 128)      # lane multiple for input dim (K of proj)
    cp = _round_up(n_class, 128)      # lane multiple for output dim

    wih_t = jnp.pad(w_ih.T, ((0, ip - n_class), (0, hp - n_hidden))
                    ).astype(jnp.bfloat16)                            # [ip, hp]
    whh_t = jnp.pad(w_hh.T, ((0, hp - n_hidden), (0, hp - n_hidden))
                    ).astype(jnp.bfloat16)                            # [hp, hp]
    b_rnn = jnp.pad((b_ih + b_hh).reshape(1, n_hidden),
                    ((0, 0), (0, hp - n_hidden))).astype(jnp.float32)  # [1, hp]
    wfc_t = jnp.pad(w_fc.T, ((0, hp - n_hidden), (0, cp - n_class))
                    ).astype(jnp.bfloat16)                            # [hp, cp]
    bfc = jnp.pad(b_fc.reshape(1, n_class),
                  ((0, 0), (0, cp - n_class))).astype(jnp.float32)    # [1, cp]

    return {
        "n_class": int(n_class), "n_hidden": int(n_hidden),
        "ip": ip, "hp": hp, "cp": cp,
        "wih_t": wih_t, "whh_t": whh_t, "b_rnn": b_rnn,
        "wfc_t": wfc_t, "bfc": bfc,
    }


def text_rnn_forward(hidden, X, prepared):
    """JAX wrapper matching TextRNN.forward(hidden, X).

    hidden: [1, batch, n_hidden]
    X     : [batch, seq, n_class]
    returns [batch, n_class]
    """
    batch, seq, n_class = X.shape
    n_hidden = prepared["n_hidden"]
    ip, hp, cp = prepared["ip"], prepared["hp"], prepared["cp"]

    bp = _round_up(max(batch, 8), 8)   # sublane multiple for the batch dim

    # Per-call glue only: time-major, pad batch + input lanes, flatten, cast the
    # MXU operand to bf16. h0 padded to [bp, hp] f32.
    x_tm = jnp.transpose(X, (1, 0, 2))                                   # [seq, b, C]
    x_tm = jnp.pad(x_tm, ((0, 0), (0, bp - batch), (0, ip - n_class)))   # [seq, bp, ip]
    x_flat = x_tm.reshape(seq * bp, ip).astype(jnp.bfloat16)             # [seq*bp, ip]
    h0 = jnp.pad(hidden[0], ((0, bp - batch), (0, hp - n_hidden))
                 ).astype(jnp.float32)                                   # [bp, hp]

    # Advisory cost (true, unpadded work) so XLA doesn't over-schedule this call.
    flops = int(2 * seq * batch * n_class * n_hidden
                + 2 * seq * batch * n_hidden * n_hidden
                + 2 * batch * n_hidden * n_class)
    transcendentals = int(seq * batch * n_hidden)
    bytes_accessed = int(4 * (X.size + hidden[0].size + batch * n_class)
                         + 2 * (prepared["wih_t"].size + prepared["whh_t"].size
                                + prepared["wfc_t"].size)
                         + 4 * (prepared["b_rnn"].size + prepared["bfc"].size))

    vmem = pl.BlockSpec(memory_space=pltpu.MemorySpace.VMEM)
    out_padded = pl.pallas_call(
        _text_rnn_kernel,
        out_shape=jax.ShapeDtypeStruct((bp, cp), jnp.float32),
        in_specs=[vmem] * 7,
        out_specs=vmem,
        cost_estimate=pl.CostEstimate(
            flops=flops,
            transcendentals=transcendentals,
            bytes_accessed=bytes_accessed),
    )(x_flat, h0, prepared["wih_t"], prepared["whh_t"], prepared["b_rnn"],
      prepared["wfc_t"], prepared["bfc"])

    return out_padded[:batch, :n_class].astype(X.dtype)


def _reference_forward(hidden, X, params):
    """Pure-JAX f32 reference mirroring the PyTorch module."""
    w_ih, w_hh, b_ih, b_hh, w_fc, b_fc = (
        params["w_ih"], params["w_hh"], params["b_ih"],
        params["b_hh"], params["w_fc"], params["b_fc"])
    x_tm = jnp.transpose(X, (1, 0, 2))
    h = hidden[0]
    for t in range(x_tm.shape[0]):
        h = jnp.tanh(x_tm[t] @ w_ih.T + b_ih + h @ w_hh.T + b_hh)
    return h @ w_fc.T + b_fc


if __name__ == "__main__":
    # Small shapes consistent with the module: batch=2, seq=8,
    # n_class=16 (vocab / one-hot dim), n_hidden=32.
    batch, seq, n_class, n_hidden = 2, 8, 16, 32

    key = jax.random.PRNGKey(0)
    keys = jax.random.split(key, 8)

    params = {
        # nn.RNN(input_size=n_class, hidden_size=n_hidden) parameter shapes:
        "w_ih": jax.random.normal(keys[0], (n_hidden, n_class), jnp.float32) * 0.1,
        "w_hh": jax.random.normal(keys[1], (n_hidden, n_hidden), jnp.float32) * 0.1,
        "b_ih": jax.random.normal(keys[2], (n_hidden,), jnp.float32) * 0.1,
        "b_hh": jax.random.normal(keys[3], (n_hidden,), jnp.float32) * 0.1,
        # nn.Linear(n_hidden, n_class):
        "w_fc": jax.random.normal(keys[4], (n_class, n_hidden), jnp.float32) * 0.1,
        "b_fc": jax.random.normal(keys[5], (n_class,), jnp.float32) * 0.1,
    }

    X = jax.random.normal(keys[6], (batch, seq, n_class), jnp.float32)
    hidden = jax.random.normal(keys[7], (1, batch, n_hidden), jnp.float32)

    # One-time parameter prep (padding / transposes / bias fusion / bf16 cast).
    prepared = prepare_text_rnn_params(params)

    out = text_rnn_forward(hidden, X, prepared)
    out = jax.block_until_ready(out)

    ref = _reference_forward(hidden, X, params)
    assert out.shape == (batch, n_class)
    # bf16 MXU operands with f32 accumulation over 8 recurrent steps: loosen the
    # tolerance vs the pure-f32 reference.
    assert jnp.allclose(out, ref, atol=2e-2, rtol=2e-2), "mismatch vs reference"

    print("KERNEL_OK")
</pallas_src>

<mosaic_0001>
module attributes {stable_mosaic.version = 11 : i64} {
  func.func @_text_rnn_kernel(%arg0: memref<64x128xbf16, #tpu.memory_space<vmem>>, %arg1: memref<8x128xf32, #tpu.memory_space<vmem>>, %arg2: memref<128x128xbf16, #tpu.memory_space<vmem>>, %arg3: memref<128x128xbf16, #tpu.memory_space<vmem>>, %arg4: memref<1x128xf32, #tpu.memory_space<vmem>>, %arg5: memref<128x128xbf16, #tpu.memory_space<vmem>>, %arg6: memref<1x128xf32, #tpu.memory_space<vmem>>, %arg7: memref<8x128xf32, #tpu.memory_space<vmem>>) attributes {dimension_semantics = [], scalar_prefetch = 0 : i64, scratch_operands = 0 : i64, tpu.core_type = #tpu.core_type<tc>} {
    %c0 = arith.constant 0 : index
    %c0_0 = arith.constant 0 : index
    %0 = vector.load %arg0[%c0, %c0_0] : memref<64x128xbf16, #tpu.memory_space<vmem>>, vector<64x128xbf16>
    %c0_1 = arith.constant 0 : index
    %c0_2 = arith.constant 0 : index
    %1 = vector.load %arg2[%c0_1, %c0_2] : memref<128x128xbf16, #tpu.memory_space<vmem>>, vector<128x128xbf16>
    %cst = arith.constant dense<0.000000e+00> : vector<64x128xf32>
    %2 = tpu.matmul %0, %1, %cst {dimension_numbers = #tpu.dot_dimension_numbers<[1], [0], [0], [1], [0, 0, 1, 1], [], []>} : vector<64x128xbf16>, vector<128x128xbf16>, vector<64x128xf32> -> vector<64x128xf32>
    %c0_3 = arith.constant 0 : index
    %c0_4 = arith.constant 0 : index
    %3 = vector.load %arg4[%c0_3, %c0_4] : memref<1x128xf32, #tpu.memory_space<vmem>>, vector<1x128xf32>
    %4 = vector.broadcast %3 : vector<1x128xf32> to vector<64x128xf32>
    %5 = arith.addf %2, %4 : vector<64x128xf32>
    %c0_5 = arith.constant 0 : index
    %c0_6 = arith.constant 0 : index
    %6 = vector.load %arg3[%c0_5, %c0_6] : memref<128x128xbf16, #tpu.memory_space<vmem>>, vector<128x128xbf16>
    %c0_7 = arith.constant 0 : index
    %c0_8 = arith.constant 0 : index
    %7 = vector.load %arg1[%c0_7, %c0_8] : memref<8x128xf32, #tpu.memory_space<vmem>>, vector<8x128xf32>
    %8 = vector.extract_strided_slice %5 {offsets = [0, 0], sizes = [8, 128], strides = [1, 1]} : vector<64x128xf32> to vector<8x128xf32>
    %9 = arith.truncf %7 : vector<8x128xf32> to vector<8x128xbf16>
    %cst_9 = arith.constant dense<0.000000e+00> : vector<8x128xf32>
    %10 = tpu.matmul %9, %6, %cst_9 {dimension_numbers = #tpu.dot_dimension_numbers<[1], [0], [0], [1], [0, 0, 1, 1], [], []>} : vector<8x128xbf16>, vector<128x128xbf16>, vector<8x128xf32> -> vector<8x128xf32>
    %11 = arith.addf %8, %10 : vector<8x128xf32>
    %12 = math.tanh %11 : vector<8x128xf32>
    %13 = vector.extract_strided_slice %5 {offsets = [8, 0], sizes = [8, 128], strides = [1, 1]} : vector<64x128xf32> to vector<8x128xf32>
    %14 = arith.truncf %12 : vector<8x128xf32> to vector<8x128xbf16>
    %cst_10 = arith.constant dense<0.000000e+00> : vector<8x128xf32>
    %15 = tpu.matmul %14, %6, %cst_10 {dimension_numbers = #tpu.dot_dimension_numbers<[1], [0], [0], [1], [0, 0, 1, 1], [], []>} : vector<8x128xbf16>, vector<128x128xbf16>, vector<8x128xf32> -> vector<8x128xf32>
    %16 = arith.addf %13, %15 : vector<8x128xf32>
    %17 = math.tanh %16 : vector<8x128xf32>
    %18 = vector.extract_strided_slice %5 {offsets = [16, 0], sizes = [8, 128], strides = [1, 1]} : vector<64x128xf32> to vector<8x128xf32>
    %19 = arith.truncf %17 : vector<8x128xf32> to vector<8x128xbf16>
    %cst_11 = arith.constant dense<0.000000e+00> : vector<8x128xf32>
    %20 = tpu.matmul %19, %6, %cst_11 {dimension_numbers = #tpu.dot_dimension_numbers<[1], [0], [0], [1], [0, 0, 1, 1], [], []>} : vector<8x128xbf16>, vector<128x128xbf16>, vector<8x128xf32> -> vector<8x128xf32>
    %21 = arith.addf %18, %20 : vector<8x128xf32>
    %22 = math.tanh %21 : vector<8x128xf32>
    %23 = vector.extract_strided_slice %5 {offsets = [24, 0], sizes = [8, 128], strides = [1, 1]} : vector<64x128xf32> to vector<8x128xf32>
    %24 = arith.truncf %22 : vector<8x128xf32> to vector<8x128xbf16>
    %cst_12 = arith.constant dense<0.000000e+00> : vector<8x128xf32>
    %25 = tpu.matmul %24, %6, %cst_12 {dimension_numbers = #tpu.dot_dimension_numbers<[1], [0], [0], [1], [0, 0, 1, 1], [], []>} : vector<8x128xbf16>, vector<128x128xbf16>, vector<8x128xf32> -> vector<8x128xf32>
    %26 = arith.addf %23, %25 : vector<8x128xf32>
    %27 = math.tanh %26 : vector<8x128xf32>
    %28 = vector.extract_strided_slice %5 {offsets = [32, 0], sizes = [8, 128], strides = [1, 1]} : vector<64x128xf32> to vector<8x128xf32>
    %29 = arith.truncf %27 : vector<8x128xf32> to vector<8x128xbf16>
    %cst_13 = arith.constant dense<0.000000e+00> : vector<8x128xf32>
    %30 = tpu.matmul %29, %6, %cst_13 {dimension_numbers = #tpu.dot_dimension_numbers<[1], [0], [0], [1], [0, 0, 1, 1], [], []>} : vector<8x128xbf16>, vector<128x128xbf16>, vector<8x128xf32> -> vector<8x128xf32>
    %31 = arith.addf %28, %30 : vector<8x128xf32>
    %32 = math.tanh %31 : vector<8x128xf32>
    %33 = vector.extract_strided_slice %5 {offsets = [40, 0], sizes = [8, 128], strides = [1, 1]} : vector<64x128xf32> to vector<8x128xf32>
    %34 = arith.truncf %32 : vector<8x128xf32> to vector<8x128xbf16>
    %cst_14 = arith.constant dense<0.000000e+00> : vector<8x128xf32>
    %35 = tpu.matmul %34, %6, %cst_14 {dimension_numbers = #tpu.dot_dimension_numbers<[1], [0], [0], [1], [0, 0, 1, 1], [], []>} : vector<8x128xbf16>, vector<128x128xbf16>, vector<8x128xf32> -> vector<8x128xf32>
    %36 = arith.addf %33, %35 : vector<8x128xf32>
    %37 = math.tanh %36 : vector<8x128xf32>
    %38 = vector.extract_strided_slice %5 {offsets = [48, 0], sizes = [8, 128], strides = [1, 1]} : vector<64x128xf32> to vector<8x128xf32>
    %39 = arith.truncf %37 : vector<8x128xf32> to vector<8x128xbf16>
    %cst_15 = arith.constant dense<0.000000e+00> : vector<8x128xf32>
    %40 = tpu.matmul %39, %6, %cst_15 {dimension_numbers = #tpu.dot_dimension_numbers<[1], [0], [0], [1], [0, 0, 1, 1], [], []>} : vector<8x128xbf16>, vector<128x128xbf16>, vector<8x128xf32> -> vector<8x128xf32>
    %41 = arith.addf %38, %40 : vector<8x128xf32>
    %42 = math.tanh %41 : vector<8x128xf32>
    %43 = vector.extract_strided_slice %5 {offsets = [56, 0], sizes = [8, 128], strides = [1, 1]} : vector<64x128xf32> to vector<8x128xf32>
    %44 = arith.truncf %42 : vector<8x128xf32> to vector<8x128xbf16>
    %cst_16 = arith.constant dense<0.000000e+00> : vector<8x128xf32>
    %45 = tpu.matmul %44, %6, %cst_16 {dimension_numbers = #tpu.dot_dimension_numbers<[1], [0], [0], [1], [0, 0, 1, 1], [], []>} : vector<8x128xbf16>, vector<128x128xbf16>, vector<8x128xf32> -> vector<8x128xf32>
    %46 = arith.addf %43, %45 : vector<8x128xf32>
    %47 = math.tanh %46 : vector<8x128xf32>
    %48 = arith.truncf %47 : vector<8x128xf32> to vector<8x128xbf16>
    %c0_17 = arith.constant 0 : index
    %c0_18 = arith.constant 0 : index
    %49 = vector.load %arg5[%c0_17, %c0_18] : memref<128x128xbf16, #tpu.memory_space<vmem>>, vector<128x128xbf16>
    %cst_19 = arith.constant dense<0.000000e+00> : vector<8x128xf32>
    %50 = tpu.matmul %48, %49, %cst_19 {dimension_numbers = #tpu.dot_dimension_numbers<[1], [0], [0], [1], [0, 0, 1, 1], [], []>} : vector<8x128xbf16>, vector<128x128xbf16>, vector<8x128xf32> -> vector<8x128xf32>
    %c0_20 = arith.constant 0 : index
    %c0_21 = arith.constant 0 : index
    %51 = vector.load %arg6[%c0_20, %c0_21] : memref<1x128xf32, #tpu.memory_space<vmem>>, vector<1x128xf32>
    %52 = vector.broadcast %51 : vector<1x128xf32> to vector<8x128xf32>
    %53 = arith.addf %50, %52 : vector<8x128xf32>
    %c0_22 = arith.constant 0 : index
    %c0_23 = arith.constant 0 : index
    %54 = vector.load %arg7[%c0_22, %c0_23] : memref<8x128xf32, #tpu.memory_space<vmem>>, vector<8x128xf32>
    tpu.vector_store %arg7[%c0_22, %c0_23], %53 {strides = array<i32>} : memref<8x128xf32, #tpu.memory_space<vmem>>, vector<8x128xf32>,
    return
  }
}

</mosaic_0001>

<bundles_post_ra>
// kernel: tpu_custom_call.1
= control target key start
LH: loop header
LB: loop body
LE: loop exit
PB: predicated region body
PF: predicated region fallthrough
CT: control target
= control target key end

     0   :  { %12 = vsyncpa [#allocation3], 0  ;;  %s1657_s0 = inlined_call_operand.hbm [shape: bf16[64,128], index: 0, kind: input, shape index: {}]   ;;  %s1658_s1 = inlined_call_operand.hbm [shape: f32[8,128], index: 1, kind: input, shape index: {}]   ;;  %s1659_s2 = inlined_call_operand.hbm [shape: bf16[128,128], index: 2, kind: input, shape index: {}]   ;;  %s1660_s3 = inlined_call_operand.hbm [shape: bf16[128,128], index: 3, kind: input, shape index: {}]   ;;  %s1661_s4 = inlined_call_operand.vmem [shape: f32[1,128], index: 4, kind: input, shape index: {}]   ;;  %s1662_s5 = inlined_call_operand.hbm [shape: bf16[128,128], index: 5, kind: input, shape index: {}]   ;;  %s1663_s6 = inlined_call_operand.vmem [shape: f32[1,128], index: 6, kind: input, shape index: {}]   ;;  %s1664_s7 = inlined_call_operand.hbm [shape: f32[8,128], index: 7, kind: output, shape index: {}]  }
   0x1   :  { %13 = vsyncpa [#allocation6], 0 }
   0x2   :  { %14 = vsyncpa [#allocation9], 0 }
   0x3   :  { %15 = vsyncpa [#allocation4], 0  ;;  %s1322_s24 = smov [#allocation5]   ;;  %s1182_s28 = scalar_lea.hbm %s1658_s1, 128 }
   0x4   :  { %s34_s25 = sshll.u32 %s1322_s24, 4  ;;  %p1183_p0 = scmp.ne.s32.totalorder %s1658_s1, %s1182_s28  ;;  %s35_s25 = int_to_ptr.vmem [resolvable:$true] %s34_s25 }
   0x5   :  { %p1186_p1 = scmp.lt.u32.totalorder %s1182_s28, %s1658_s1 }
   0x7   :  { %p1188_p2 = pnand %p1186_p1, %p1183_p0 }
   0x9   :  { %1191 = shalt.err (!%p1188_p2)
}
   0xa   :  { %s1192_s10 = scalar_lea.vmem %s35_s25, 128  ;;  %p1197_p4 = scmp.lt.s32.totalorder %s35_s25, %s35_s25 }
   0xb   :  { %p1193_p3 = scmp.ne.s32.totalorder %s35_s25, %s1192_s10  ;;  %p1198_p5 = scmp.lt.s32.totalorder %s1192_s10, %s1192_s10 }
   0xd   :  { %p1199_p6 = por %p1198_p5, %p1197_p4 }
   0xf   :  { %p1200_p7 = pnand %p1199_p6, %p1193_p3 }
  0x11   :  { %1203 = shalt.err (!%p1200_p7)
}
  0x12   :  { %37 = dma.hbm_to_vmem [thread:$0]  %s1658_s1, 128, %s35_s25, [#allocation6]  }
  0x13   :  { %s1323_s13 = smov [#allocation8]   ;;  %s1324_s15 = smov [#allocation2]  }
  0x14   :  { %s55_s14 = sshll.u32 %s1323_s13, 4  ;;  %s21_s16 = sshll.u32 %s1324_s15, 4  ;;  %s56_s14 = int_to_ptr.vmem [resolvable:$true] %s55_s14  ;;  %s22_s16 = int_to_ptr.vmem [resolvable:$true] %s21_s16 }
  0x15   :  { %s1204_s19 = scalar_lea.hbm %s1660_s3, 1024 }
  0x16   :  { %p1205_p8 = scmp.ne.s32.totalorder %s1660_s3, %s1204_s19  ;;  %p1208_p9 = scmp.lt.u32.totalorder %s1204_s19, %s1660_s3 }
  0x18   :  { %p1210_p10 = pnand %p1208_p9, %p1205_p8 }
  0x1a   :  { %1213 = shalt.err (!%p1210_p10)
}
  0x1b   :  { %s1214_s1 = scalar_lea.vmem %s56_s14, 1024  ;;  %p1219_p12 = scmp.lt.s32.totalorder %s56_s14, %s56_s14 }
  0x1c   :  { %p1215_p11 = scmp.ne.s32.totalorder %s56_s14, %s1214_s1  ;;  %p1220_p13 = scmp.lt.s32.totalorder %s1214_s1, %s1214_s1 }
  0x1e   :  { %p1221_p0 = por %p1220_p13, %p1219_p12 }
  0x20   :  { %p1222_p1 = pnand %p1221_p0, %p1215_p11 }
  0x22   :  { %1225 = shalt.err (!%p1222_p1)
}
  0x23   :  { %s1325_s24 = smov 64   ;;  %s1326_s25 = smov 4  }
  0x24   :  { %61 = dma.hbm_to_vmem [thread:$0]  %s1660_s3, 1024, %s56_s14, [#allocation9], %s1325_s24, %s1325_s24, %s1326_s25  }
  0x25   :  { %s1226_s30 = scalar_lea.hbm %s1657_s0, 512 }
  0x26   :  { %p1227_p2 = scmp.ne.s32.totalorder %s1657_s0, %s1226_s30  ;;  %p1230_p3 = scmp.lt.u32.totalorder %s1226_s30, %s1657_s0 }
  0x28   :  { %p1232_p4 = pnand %p1230_p3, %p1227_p2 }
  0x2a   :  { %1235 = shalt.err (!%p1232_p4)
}
  0x2b   :  { %s1236_s12 = scalar_lea.vmem %s22_s16, 512  ;;  %p1241_p6 = scmp.lt.s32.totalorder %s22_s16, %s22_s16 }
  0x2c   :  { %p1237_p5 = scmp.ne.s32.totalorder %s22_s16, %s1236_s12  ;;  %p1242_p7 = scmp.lt.s32.totalorder %s1236_s12, %s1236_s12 }
  0x2e   :  { %p1243_p8 = por %p1242_p7, %p1241_p6 }
  0x30   :  { %p1244_p9 = pnand %p1243_p8, %p1237_p5 }
  0x32   :  { %1247 = shalt.err (!%p1244_p9)
}
  0x33   :  { %27 = dma.hbm_to_vmem [thread:$0]  %s1657_s0, 512, %s22_s16, [#allocation3], %s1325_s24, %s1325_s24, %s1326_s25  }
  0x34   :  { %s1327_s14 = smov [#allocation7]   ;;  %s1328_s17 = smov [#allocation10]  }
  0x35   :  { %s43_s15 = sshll.u32 %s1327_s14, 4  ;;  %s69_s18 = sshll.u32 %s1328_s17, 4  ;;  %s44_s15 = int_to_ptr.vmem [resolvable:$true] %s43_s15  ;;  %s70_s18 = int_to_ptr.vmem [resolvable:$true] %s69_s18 }
  0x36   :  { %s1248_s21 = scalar_lea.hbm %s1659_s2, 1024 }
  0x37   :  { %p1249_p10 = scmp.ne.s32.totalorder %s1659_s2, %s1248_s21  ;;  %p1252_p11 = scmp.lt.u32.totalorder %s1248_s21, %s1659_s2 }
  0x39   :  { %p1254_p12 = pnand %p1252_p11, %p1249_p10 }
  0x3b   :  { %1257 = shalt.err (!%p1254_p12)
}
  0x3c   :  { %s1258_s0 = scalar_lea.vmem %s44_s15, 1024  ;;  %p1263_p0 = scmp.lt.s32.totalorder %s44_s15, %s44_s15 }
  0x3d   :  { %p1259_p13 = scmp.ne.s32.totalorder %s44_s15, %s1258_s0  ;;  %p1264_p1 = scmp.lt.s32.totalorder %s1258_s0, %s1258_s0 }
  0x3f   :  { %p1265_p2 = por %p1264_p1, %p1263_p0 }
  0x41   :  { %p1266_p3 = pnand %p1265_p2, %p1259_p13 }
  0x43   :  { %1269 = shalt.err (!%p1266_p3)
}
  0x44   :  { %49 = dma.hbm_to_vmem [thread:$0]  %s1659_s2, 1024, %s44_s15, [#allocation6], %s1325_s24, %s1325_s24, %s1326_s25  }
  0x45   :  { %s1270_s30 = scalar_lea.hbm %s1662_s5, 1024 }
  0x46   :  { %p1271_p4 = scmp.ne.s32.totalorder %s1662_s5, %s1270_s30  ;;  %p1274_p5 = scmp.lt.u32.totalorder %s1270_s30, %s1662_s5 }
  0x48   :  { %p1276_p6 = pnand %p1274_p5, %p1271_p4 }
  0x4a   :  { %1279 = shalt.err (!%p1276_p6)
}
  0x4b   :  { %s1280_s12 = scalar_lea.vmem %s70_s18, 1024  ;;  %p1285_p8 = scmp.lt.s32.totalorder %s70_s18, %s70_s18 }
  0x4c   :  { %p1281_p7 = scmp.ne.s32.totalorder %s70_s18, %s1280_s12  ;;  %p1286_p9 = scmp.lt.s32.totalorder %s1280_s12, %s1280_s12 }
  0x4e   :  { %p1287_p10 = por %p1286_p9, %p1285_p8 }
  0x50   :  { %p1288_p11 = pnand %p1287_p10, %p1281_p7 }
  0x52   :  { %1291 = shalt.err (!%p1288_p11)
}
  0x53   :  { %75 = dma.hbm_to_vmem [thread:$0]  %s1662_s5, 1024, %s70_s18, [#allocation9], %s1325_s24, %s1325_s24, %s1326_s25  }
  0x54   :  { %1314 = dma.done.wait [#allocation3], 512  }
  0x55   :  { %1315 = vsyncadd [#allocation3], 4294966784 }
  0x56   :  { %1316 = dma.done.wait [#allocation6], 1152  }
  0x57   :  { %1317 = vsyncadd [#allocation6], 4294966144 }
  0x58   :  { %1318 = dma.done.wait [#allocation9], 2048  }
  0x59   :  { %1319 = vsyncadd [#allocation9], 4294965248  ;;  %v1329_v0 = vmov 0.0   ;;  %vm1330_vm0 = vmmov 0   ;;  %v1138_v1 = vld [vmem:[#allocation7] sm:$0xff]   ;;  %v1140_v3 = vld [vmem:[#allocation7 + $0x8] sm:$0xff]  }
  0x5a   :  { %948 = vmatprep.subr.bf16.mxu1 %v1329_v0  ;;  %964 = vmatprep.mubr.msk.bf16.mxu1 %vm1330_vm0, %v1329_v0  ;;  %v1447_v2 = vld [vmem:[#allocation8] sm:$0xff]   ;;  %v1450_v4 = vld [vmem:[#allocation8 + $0x8] sm:$0xff]   ;;  %v1142_v5 = vld [vmem:[#allocation7 + $0x10] sm:$0xff]   ;;  %s1331_s13 = smov [#allocation11]  }
  0x5b   :  { %924 = vmatprep.subr.bf16.mxu0 %v1138_v1  ;;  %949 = vmatpush3.bf16.msra.mxu1 %v1447_v2  ;;  %v1454_v6 = vld [vmem:[#allocation8 + $0x10] sm:$0xff]   ;;  %v1144_v7 = vld [vmem:[#allocation7 + $0x18] sm:$0xff]   ;;  %v1146_v9 = vld [vmem:[#allocation7 + $0x20] sm:$0xff]   ;;  %s790_s14 = sshll.u32 %s1331_s13, 4  ;;  %s791_s14 = int_to_ptr.vmem [resolvable:$true] %s790_s14 }
  0x5c   :  { %925 = vmatpush3.bf16.msra.mxu0 %v1138_v1  ;;  %950 = vmatprep.subr.bf16.mxu1 %v1329_v0  ;;  %v1458_v8 = vld [vmem:[#allocation8 + $0x18] sm:$0xff]   ;;  %v1461_v10 = vld [vmem:[#allocation8 + $0x20] sm:$0xff]   ;;  %v1148_v11 = vld [vmem:[#allocation7 + $0x28] sm:$0xff]   ;;  %s1292_s15 = scalar_lea.vmem %s791_s14, 128  ;;  %p1297_p13 = scmp.lt.s32.totalorder %s791_s14, %s791_s14 }
  0x5d   :  { %926 = vmatprep.subr.bf16.mxu0 %v1140_v3  ;;  %v1154_v12 = vld [vmem:[#allocation2] sm:$0xff]   ;;  %v1465_v13 = vld [vmem:[#allocation8 + $0x28] sm:$0xff]   ;;  %v1150_v14 = vld [vmem:[#allocation7 + $0x30] sm:$0xff]   ;;  %p1293_p12 = scmp.ne.s32.totalorder %s791_s14, %s1292_s15  ;;  %p1298_p0 = scmp.lt.s32.totalorder %s1292_s15, %s1292_s15 }
  0x5e   :  { %940 = vmatprep.mubr.bf16.mxu0 %v1154_v12  ;;  %v1469_v15 = vld [vmem:[#allocation8 + $0x30] sm:$0xff]   ;;  %v1152_v16 = vld [vmem:[#allocation7 + $0x38] sm:$0xff]   ;;  %v1155_v19 = vld [vmem:[#allocation2 + $0x8] sm:$0xff]  }
  0x5f   :  { %951 = vmatpush3.bf16.msra.mxu1 %v1450_v4  ;;  %v1474_v17 = vld [vmem:[#allocation8 + $0x38] sm:$0xff]   ;;  %v1156_v21 = vld [vmem:[#allocation2 + $0x10] sm:$0xff]   ;;  %v1157_v22 = vld [vmem:[#allocation2 + $0x18] sm:$0xff]   ;;  %p1299_p1 = por %p1298_p0, %p1297_p13 }
  0x60   :  { %927 = vmatpush3.bf16.msra.mxu0 %v1140_v3  ;;  %952 = vmatprep.subr.bf16.mxu1 %v1329_v0  ;;  %v278_v18 = vld [vmem:[#allocation5] sm:$0xff] }
  0x61   :  { %928 = vmatprep.subr.bf16.mxu0 %v1142_v5  ;;  %v279_v20 = vpack.c.bf16 %v278_v18, %v278_v18  ;;  %v1519_v23 = vld [vmem:[%s1661_s4] ss:$0 sm:$0xff]  ;;  %p1300_p2 = pnand %p1299_p1, %p1293_p12 }
  0x63   :  { %953 = vmatpush3.bf16.msra.mxu1 %v1454_v6 }
  0x64   :  { %929 = vmatpush3.bf16.msra.mxu0 %v1142_v5  ;;  %954 = vmatprep.subr.bf16.mxu1 %v1329_v0 }
  0x65   :  { %930 = vmatprep.subr.bf16.mxu0 %v1144_v7 }
  0x67   :  { %955 = vmatpush3.bf16.msra.mxu1 %v1458_v8 }
  0x68   :  { %931 = vmatpush3.bf16.msra.mxu0 %v1144_v7  ;;  %956 = vmatprep.subr.bf16.mxu1 %v1329_v0 }
  0x69   :  { %932 = vmatprep.subr.bf16.mxu0 %v1146_v9 }
  0x6b   :  { %957 = vmatpush3.bf16.msra.mxu1 %v1461_v10 }
  0x6c   :  { %933 = vmatpush3.bf16.msra.mxu0 %v1146_v9  ;;  %958 = vmatprep.subr.bf16.mxu1 %v1329_v0 }
  0x6d   :  { %934 = vmatprep.subr.bf16.mxu0 %v1148_v11 }
  0x6f   :  { %959 = vmatpush3.bf16.msra.mxu1 %v1465_v13 }
  0x70   :  { %935 = vmatpush3.bf16.msra.mxu0 %v1148_v11  ;;  %960 = vmatprep.subr.bf16.mxu1 %v1329_v0 }
  0x71   :  { %936 = vmatprep.subr.bf16.mxu0 %v1150_v14 }
  0x73   :  { %961 = vmatpush3.bf16.msra.mxu1 %v1469_v15 }
  0x74   :  { %937 = vmatpush3.bf16.msra.mxu0 %v1150_v14  ;;  %962 = vmatprep.subr.bf16.mxu1 %v1329_v0 }
  0x75   :  { %938 = vmatprep.subr.bf16.mxu0 %v1152_v16 }
  0x77   :  { %963 = vmatpush3.bf16.msra.mxu1 %v1474_v17 }
  0x78   :  { %939 = vmatpush3.bf16.msra.mxu0 %v1152_v16  ;;  %988 = vmatprep.subr.bf16.mxu1 %v1329_v0 }
  0x79   :  { %968 = vmatprep.subr.bf16.mxu0 %v1329_v0 }
  0x7a   :  { %965 = vmatmul.mubr.bf16.vlgmr.msra.gmra.mrb[0].mxu1 %v279_v20  ;;  %v1161_v20 = vld [vmem:[#allocation10 + $0x18] sm:$0xff]  }
  0x7b   :  { %941 = vmatmul.mubr.bf16.vlgmr.msra.gmra.mrb[0].mxu0 %v1155_v19  ;;  %989 = vmatpush3.bf16.msra.mxu1 %v1447_v2 }
  0x7c   :  { %969 = vmatpush3.bf16.msra.mxu0 %v1447_v2  ;;  %990 = vmatprep.subr.bf16.mxu1 %v1329_v0 }
  0x7d   :  { %970 = vmatprep.subr.bf16.mxu0 %v1329_v0  ;;  %1004 = vmatprep.mubr.msk.bf16.mxu1 %vm1330_vm0, %v1329_v0 }
  0x7e   :  { %944 = vmatprep.mubr.bf16.mxu0 %v1156_v21 }
  0x7f   :  { %991 = vmatpush3.bf16.msra.mxu1 %v1450_v4 }
  0x80   :  { %971 = vmatpush3.bf16.msra.mxu0 %v1450_v4  ;;  %992 = vmatprep.subr.bf16.mxu1 %v1329_v0 }
  0x81   :  { %972 = vmatprep.subr.bf16.mxu0 %v1329_v0 }
  0x83   :  { %993 = vmatpush3.bf16.msra.mxu1 %v1454_v6  ;;  %945 = vmatmul.mubr.bf16.gmra.mrb[4].mxu0 %v1157_v22 }
  0x84   :  { %973 = vmatpush3.bf16.msra.mxu0 %v1454_v6  ;;  %994 = vmatprep.subr.bf16.mxu1 %v1329_v0 }
  0x85   :  { %974 = vmatprep.subr.bf16.mxu0 %v1329_v0  ;;  %984 = vmatprep.mubr.msk.bf16.mxu0 %vm1330_vm0, %v1329_v0 }
  0x87   :  { %995 = vmatpush3.bf16.msra.mxu1 %v1458_v8 }
  0x88   :  { %975 = vmatpush3.bf16.msra.mxu0 %v1458_v8  ;;  %996 = vmatprep.subr.bf16.mxu1 %v1329_v0 }
  0x89   :  { %976 = vmatprep.subr.bf16.mxu0 %v1329_v0 }
  0x8b   :  { %997 = vmatpush3.bf16.msra.mxu1 %v1461_v10 }
  0x8c   :  { %977 = vmatpush3.bf16.msra.mxu0 %v1461_v10  ;;  %998 = vmatprep.subr.bf16.mxu1 %v1329_v0 }
  0x8d   :  { %978 = vmatprep.subr.bf16.mxu0 %v1329_v0 }
  0x8f   :  { %999 = vmatpush3.bf16.msra.mxu1 %v1465_v13 }
  0x90   :  { %979 = vmatpush3.bf16.msra.mxu0 %v1465_v13  ;;  %1000 = vmatprep.subr.bf16.mxu1 %v1329_v0 }
  0x91   :  { %980 = vmatprep.subr.bf16.mxu0 %v1329_v0 }
  0x93   :  { %1001 = vmatpush3.bf16.msra.mxu1 %v1469_v15 }
  0x94   :  { %981 = vmatpush3.bf16.msra.mxu0 %v1469_v15  ;;  %1002 = vmatprep.subr.bf16.mxu1 %v1329_v0 }
  0x95   :  { %982 = vmatprep.subr.bf16.mxu0 %v1329_v0 }
  0x97   :  { %1003 = vmatpush3.bf16.msra.mxu1 %v1474_v17 }
  0x98   :  { %983 = vmatpush3.bf16.msra.mxu0 %v1474_v17  ;;  %1028 = vmatprep.subr.bf16.mxu1 %v1329_v0 }
  0x99   :  { %1008 = vmatprep.subr.bf16.mxu0 %v1329_v0 }
 0x14d   :  { %v362_v25 = vpop.f32.mrb[0].mxu1 }
 0x14e   :  { %v942_v24 = vpop.f32.mrb[0].mxu0  ;;  %v966_v27 = vpop.f32.mrb[1].mxu1 }
 0x14f   :  { %v231_v26 = vpop.f32.mrb[1].mxu0  ;;  %v365_v30 = vpop.f32.mrb[2].mxu1  ;;  %v240_v48 = vadd.f32 %v942_v24, %v1519_v23 }
 0x150   :  { %v232_v28 = vadd.f32 %v1519_v23, %v231_v26  ;;  %v1522_v29 = vpop.f32.mrb[2].mxu0  ;;  %v967_v32 = vpop.f32.mrb[3].mxu1  ;;  %v1162_v30 = vld [vmem:[#allocation10 + $0x20] sm:$0xff]  }
 0x151   :  { %v234_v31 = vpop.f32.mrb[3].mxu0  ;;  %v243_v56 = vadd.f32 %v1522_v29, %v1519_v23  ;;  %v1164_v32 = vld [vmem:[#allocation10 + $0x30] sm:$0xff]  }
 0x152   :  { %v368_v33 = vadd.f32 %v362_v25, %v232_v28  ;;  %v235_v40 = vadd.f32 %v1519_v23, %v234_v31  ;;  %v1163_v31 = vld [vmem:[#allocation10 + $0x28] sm:$0xff]  }
 0x154   :  { %1166 = vtanh.f32 %v368_v33  ;;  %v1165_v33 = vld [vmem:[#allocation10 + $0x38] sm:$0xff]  }
 0x156   :  { %v1542_v36 = vpop.f32.mrb[4].mxu0 }
 0x157   :  { %v1544_v37 = vpop.f32.mrb[5].mxu0  ;;  %v256_v21 = vadd.f32 %v1542_v36, %v1519_v23 }
 0x158   :  { %v1546_v38 = vpop.f32.mrb[6].mxu0  ;;  %v248_v1 = vadd.f32 %v1519_v23, %v1544_v37 }
 0x159   :  { %v1548_v39 = vpop.f32.mrb[7].mxu0 }
 0x15e   :  { %v1167_v34 = vpop.eup %1166 }
 0x15f   :  { %v370_v35 = vpack.c.bf16 %v1167_v34, %v1167_v34  ;;  %v259_v34 = vadd.f32 %v1546_v38, %v1519_v23 }
 0x161   :  { %985 = vmatmul.mubr.bf16.vlgmr.msra.gmra.mrb[8].mxu0 %v370_v35 }
 0x162   :  { %1009 = vmatpush3.bf16.msra.mxu0 %v1447_v2  ;;  %1024 = vmatprep.mubr.msk.bf16.mxu0 %vm1330_vm0, %v1329_v0 }
 0x163   :  { %1010 = vmatprep.subr.bf16.mxu0 %v1329_v0 }
 0x166   :  { %1011 = vmatpush3.bf16.msra.mxu0 %v1450_v4 }
 0x167   :  { %1012 = vmatprep.subr.bf16.mxu0 %v1329_v0 }
 0x16a   :  { %1013 = vmatpush3.bf16.msra.mxu0 %v1454_v6 }
 0x16b   :  { %1014 = vmatprep.subr.bf16.mxu0 %v1329_v0 }
 0x16e   :  { %1015 = vmatpush3.bf16.msra.mxu0 %v1458_v8 }
 0x16f   :  { %1016 = vmatprep.subr.bf16.mxu0 %v1329_v0 }
 0x172   :  { %1017 = vmatpush3.bf16.msra.mxu0 %v1461_v10 }
 0x173   :  { %1018 = vmatprep.subr.bf16.mxu0 %v1329_v0 }
 0x176   :  { %1019 = vmatpush3.bf16.msra.mxu0 %v1465_v13 }
 0x177   :  { %1020 = vmatprep.subr.bf16.mxu0 %v1329_v0 }
 0x17a   :  { %1021 = vmatpush3.bf16.msra.mxu0 %v1469_v15 }
 0x17b   :  { %1022 = vmatprep.subr.bf16.mxu0 %v1329_v0 }
 0x17e   :  { %1023 = vmatpush3.bf16.msra.mxu0 %v1474_v17 }
 0x17f   :  { %1048 = vmatprep.subr.bf16.mxu0 %v1329_v0 }
 0x234   :  { %v405_v41 = vpop.f32.mrb[8].mxu0 }
 0x235   :  { %v411_v42 = vadd.f32 %v405_v41, %v235_v40  ;;  %v986_v43 = vpop.f32.mrb[9].mxu0 }
 0x236   :  { %v408_v44 = vpop.f32.mrb[10].mxu0  ;;  %v822_v43 = vld [vmem:[%s1663_s6] ss:$0 sm:$0xff] }
 0x237   :  { %1168 = vtanh.f32 %v411_v42  ;;  %v987_v45 = vpop.f32.mrb[11].mxu0 }
 0x241   :  { %v1169_v46 = vpop.eup %1168 }
 0x242   :  { %v413_v47 = vpack.c.bf16 %v1169_v46, %v1169_v46 }
 0x244   :  { %1005 = vmatmul.mubr.bf16.vlgmr.msra.gmra.mrb[4].mxu1 %v413_v47 }
 0x245   :  { %1029 = vmatpush3.bf16.msra.mxu1 %v1447_v2  ;;  %1044 = vmatprep.mubr.msk.bf16.mxu1 %vm1330_vm0, %v1329_v0 }
 0x246   :  { %1030 = vmatprep.subr.bf16.mxu1 %v1329_v0 }
 0x249   :  { %1031 = vmatpush3.bf16.msra.mxu1 %v1450_v4 }
 0x24a   :  { %1032 = vmatprep.subr.bf16.mxu1 %v1329_v0 }
 0x24d   :  { %1033 = vmatpush3.bf16.msra.mxu1 %v1454_v6 }
 0x24e   :  { %1034 = vmatprep.subr.bf16.mxu1 %v1329_v0 }
 0x251   :  { %1035 = vmatpush3.bf16.msra.mxu1 %v1458_v8 }
 0x252   :  { %1036 = vmatprep.subr.bf16.mxu1 %v1329_v0 }
 0x255   :  { %1037 = vmatpush3.bf16.msra.mxu1 %v1461_v10 }
 0x256   :  { %1038 = vmatprep.subr.bf16.mxu1 %v1329_v0 }
 0x259   :  { %1039 = vmatpush3.bf16.msra.mxu1 %v1465_v13 }
 0x25a   :  { %1040 = vmatprep.subr.bf16.mxu1 %v1329_v0 }
 0x25d   :  { %1041 = vmatpush3.bf16.msra.mxu1 %v1469_v15 }
 0x25e   :  { %1042 = vmatprep.subr.bf16.mxu1 %v1329_v0 }
 0x261   :  { %1043 = vmatpush3.bf16.msra.mxu1 %v1474_v17 }
 0x262   :  { %1068 = vmatprep.subr.bf16.mxu1 %v1329_v0 }
 0x317   :  { %v448_v49 = vpop.f32.mrb[4].mxu1 }
 0x318   :  { %v454_v50 = vadd.f32 %v448_v49, %v240_v48  ;;  %v1006_v51 = vpop.f32.mrb[5].mxu1 }
 0x319   :  { %v451_v52 = vpop.f32.mrb[6].mxu1 }
 0x31a   :  { %1170 = vtanh.f32 %v454_v50  ;;  %v1007_v53 = vpop.f32.mrb[7].mxu1 }
 0x324   :  { %v1171_v54 = vpop.eup %1170 }
 0x325   :  { %v456_v55 = vpack.c.bf16 %v1171_v54, %v1171_v54 }
 0x327   :  { %1025 = vmatmul.mubr.bf16.vlgmr.msra.gmra.mrb[12].mxu0 %v456_v55 }
 0x328   :  { %1049 = vmatpush3.bf16.msra.mxu0 %v1447_v2  ;;  %1064 = vmatprep.mubr.msk.bf16.mxu0 %vm1330_vm0, %v1329_v0 }
 0x329   :  { %1050 = vmatprep.subr.bf16.mxu0 %v1329_v0 }
 0x32c   :  { %1051 = vmatpush3.bf16.msra.mxu0 %v1450_v4 }
 0x32d   :  { %1052 = vmatprep.subr.bf16.mxu0 %v1329_v0 }
 0x330   :  { %1053 = vmatpush3.bf16.msra.mxu0 %v1454_v6 }
 0x331   :  { %1054 = vmatprep.subr.bf16.mxu0 %v1329_v0 }
 0x334   :  { %1055 = vmatpush3.bf16.msra.mxu0 %v1458_v8 }
 0x335   :  { %1056 = vmatprep.subr.bf16.mxu0 %v1329_v0 }
 0x338   :  { %1057 = vmatpush3.bf16.msra.mxu0 %v1461_v10 }
 0x339   :  { %1058 = vmatprep.subr.bf16.mxu0 %v1329_v0 }
 0x33c   :  { %1059 = vmatpush3.bf16.msra.mxu0 %v1465_v13 }
 0x33d   :  { %1060 = vmatprep.subr.bf16.mxu0 %v1329_v0 }
 0x340   :  { %1061 = vmatpush3.bf16.msra.mxu0 %v1469_v15 }
 0x341   :  { %1062 = vmatprep.subr.bf16.mxu0 %v1329_v0 }
 0x344   :  { %1063 = vmatpush3.bf16.msra.mxu0 %v1474_v17 }
 0x345   :  { %1088 = vmatprep.subr.bf16.mxu0 %v1329_v0 }
 0x3fa   :  { %v491_v57 = vpop.f32.mrb[12].mxu0 }
 0x3fb   :  { %v497_v58 = vadd.f32 %v491_v57, %v243_v56  ;;  %v1026_v59 = vpop.f32.mrb[13].mxu0 }
 0x3fc   :  { %v494_v60 = vpop.f32.mrb[14].mxu0 }
 0x3fd   :  { %1172 = vtanh.f32 %v497_v58  ;;  %v1027_v61 = vpop.f32.mrb[15].mxu0 }
 0x407   :  { %v1173_v62 = vpop.eup %1172 }
 0x408   :  { %v499_v63 = vpack.c.bf16 %v1173_v62, %v1173_v62 }
 0x40a   :  { %1045 = vmatmul.mubr.bf16.vlgmr.msra.gmra.mrb[8].mxu1 %v499_v63 }
 0x40b   :  { %1069 = vmatpush3.bf16.msra.mxu1 %v1447_v2  ;;  %1084 = vmatprep.mubr.msk.bf16.mxu1 %vm1330_vm0, %v1329_v0 }
 0x40c   :  { %1070 = vmatprep.subr.bf16.mxu1 %v1329_v0 }
 0x40f   :  { %1071 = vmatpush3.bf16.msra.mxu1 %v1450_v4 }
 0x410   :  { %1072 = vmatprep.subr.bf16.mxu1 %v1329_v0 }
 0x413   :  { %1073 = vmatpush3.bf16.msra.mxu1 %v1454_v6 }
 0x414   :  { %1074 = vmatprep.subr.bf16.mxu1 %v1329_v0 }
 0x417   :  { %1075 = vmatpush3.bf16.msra.mxu1 %v1458_v8 }
 0x418   :  { %1076 = vmatprep.subr.bf16.mxu1 %v1329_v0 }
 0x41b   :  { %1077 = vmatpush3.bf16.msra.mxu1 %v1461_v10 }
 0x41c   :  { %1078 = vmatprep.subr.bf16.mxu1 %v1329_v0 }
 0x41f   :  { %1079 = vmatpush3.bf16.msra.mxu1 %v1465_v13 }
 0x420   :  { %1080 = vmatprep.subr.bf16.mxu1 %v1329_v0 }
 0x423   :  { %1081 = vmatpush3.bf16.msra.mxu1 %v1469_v15 }
 0x424   :  { %1082 = vmatprep.subr.bf16.mxu1 %v1329_v0 }
 0x427   :  { %1083 = vmatpush3.bf16.msra.mxu1 %v1474_v17 }
 0x428   :  { %1108 = vmatprep.subr.bf16.mxu1 %v1329_v0 }
 0x4dd   :  { %v534_v3 = vpop.f32.mrb[8].mxu1 }
 0x4de   :  { %v540_v5 = vadd.f32 %v534_v3, %v248_v1  ;;  %v1046_v7 = vpop.f32.mrb[9].mxu1 }
 0x4df   :  { %v537_v9 = vpop.f32.mrb[10].mxu1 }
 0x4e0   :  { %1174 = vtanh.f32 %v540_v5  ;;  %v1047_v11 = vpop.f32.mrb[11].mxu1 }
 0x4ea   :  { %v1175_v12 = vpop.eup %1174 }
 0x4eb   :  { %v542_v14 = vpack.c.bf16 %v1175_v12, %v1175_v12 }
 0x4ed   :  { %1065 = vmatmul.mubr.bf16.vlgmr.msra.gmra.mrb[16].mxu0 %v542_v14 }
 0x4ee   :  { %1089 = vmatpush3.bf16.msra.mxu0 %v1447_v2  ;;  %1104 = vmatprep.mubr.msk.bf16.mxu0 %vm1330_vm0, %v1329_v0  ;;  %v251_v2 = vadd.f32 %v1519_v23, %v1548_v39 }
 0x4ef   :  { %1090 = vmatprep.subr.bf16.mxu0 %v1329_v0 }
 0x4f2   :  { %1091 = vmatpush3.bf16.msra.mxu0 %v1450_v4 }
 0x4f3   :  { %1092 = vmatprep.subr.bf16.mxu0 %v1329_v0 }
 0x4f6   :  { %1093 = vmatpush3.bf16.msra.mxu0 %v1454_v6 }
 0x4f7   :  { %1094 = vmatprep.subr.bf16.mxu0 %v1329_v0 }
 0x4fa   :  { %1095 = vmatpush3.bf16.msra.mxu0 %v1458_v8 }
 0x4fb   :  { %1096 = vmatprep.subr.bf16.mxu0 %v1329_v0 }
 0x4fe   :  { %1097 = vmatpush3.bf16.msra.mxu0 %v1461_v10 }
 0x4ff   :  { %1098 = vmatprep.subr.bf16.mxu0 %v1329_v0 }
 0x502   :  { %1099 = vmatpush3.bf16.msra.mxu0 %v1465_v13  ;;  %v1158_v13 = vld [vmem:[#allocation10] sm:$0xff]  }
 0x503   :  { %1100 = vmatprep.subr.bf16.mxu0 %v1329_v0 }
 0x506   :  { %1101 = vmatpush3.bf16.msra.mxu0 %v1469_v15  ;;  %v1159_v15 = vld [vmem:[#allocation10 + $0x8] sm:$0xff]  }
 0x507   :  { %1102 = vmatprep.subr.bf16.mxu0 %v1329_v0 }
 0x50a   :  { %1103 = vmatpush3.bf16.msra.mxu0 %v1474_v17  ;;  %v1160_v17 = vld [vmem:[#allocation10 + $0x10] sm:$0xff]  }
 0x5c0   :  { %v577_v4 = vpop.f32.mrb[16].mxu0 }
 0x5c1   :  { %v583_v6 = vadd.f32 %v577_v4, %v251_v2  ;;  %v1066_v8 = vpop.f32.mrb[17].mxu0 }
 0x5c2   :  { %v580_v16 = vpop.f32.mrb[18].mxu0 }
 0x5c3   :  { %1176 = vtanh.f32 %v583_v6  ;;  %v1067_v10 = vpop.f32.mrb[19].mxu0 }
 0x5cd   :  { %v1177_v18 = vpop.eup %1176 }
 0x5ce   :  { %v585_v19 = vpack.c.bf16 %v1177_v18, %v1177_v18 }
 0x5d0   :  { %1085 = vmatmul.mubr.bf16.vlgmr.msra.gmra.mrb[12].mxu1 %v585_v19 }
 0x5d1   :  { %1124 = vmatprep.mubr.msk.bf16.mxu1 %vm1330_vm0, %v1329_v0  ;;  %1109 = vmatpush3.bf16.msra.mxu1 %v1158_v13 }
 0x5d2   :  { %1110 = vmatprep.subr.bf16.mxu1 %v1329_v0 }
 0x5d5   :  { %1111 = vmatpush3.bf16.msra.mxu1 %v1159_v15 }
 0x5d6   :  { %1112 = vmatprep.subr.bf16.mxu1 %v1329_v0 }
 0x5d9   :  { %1113 = vmatpush3.bf16.msra.mxu1 %v1160_v17 }
 0x5da   :  { %1114 = vmatprep.subr.bf16.mxu1 %v1329_v0 }
 0x5dd   :  { %1115 = vmatpush3.bf16.msra.mxu1 %v1161_v20 }
 0x5de   :  { %1116 = vmatprep.subr.bf16.mxu1 %v1329_v0 }
 0x5e1   :  { %1117 = vmatpush3.bf16.msra.mxu1 %v1162_v30 }
 0x5e2   :  { %1118 = vmatprep.subr.bf16.mxu1 %v1329_v0 }
 0x5e5   :  { %1119 = vmatpush3.bf16.msra.mxu1 %v1163_v31 }
 0x5e6   :  { %1120 = vmatprep.subr.bf16.mxu1 %v1329_v0 }
 0x5e9   :  { %1121 = vmatpush3.bf16.msra.mxu1 %v1164_v32 }
 0x5ea   :  { %1122 = vmatprep.subr.bf16.mxu1 %v1329_v0 }
 0x5ed   :  { %1123 = vmatpush3.bf16.msra.mxu1 %v1165_v33 }
 0x6a3   :  { %v620_v22 = vpop.f32.mrb[12].mxu1 }
 0x6a4   :  { %v626_v24 = vadd.f32 %v620_v22, %v256_v21  ;;  %v1086_v25 = vpop.f32.mrb[13].mxu1 }
 0x6a5   :  { %v623_v26 = vpop.f32.mrb[14].mxu1 }
 0x6a6   :  { %1178 = vtanh.f32 %v626_v24  ;;  %v1087_v27 = vpop.f32.mrb[15].mxu1 }
 0x6b0   :  { %v1179_v28 = vpop.eup %1178 }
 0x6b1   :  { %v628_v29 = vpack.c.bf16 %v1179_v28, %v1179_v28 }
 0x6b3   :  { %1105 = vmatmul.mubr.bf16.vlgmr.msra.gmra.mrb[20].mxu0 %v628_v29 }
 0x786   :  { %v663_v35 = vpop.f32.mrb[20].mxu0 }
 0x787   :  { %v669_v36 = vadd.f32 %v663_v35, %v259_v34  ;;  %v1106_v37 = vpop.f32.mrb[21].mxu0 }
 0x788   :  { %v666_v39 = vpop.f32.mrb[22].mxu0 }
 0x789   :  { %1180 = vtanh.f32 %v669_v36  ;;  %v1107_v40 = vpop.f32.mrb[23].mxu0 }
 0x793   :  { %v1181_v41 = vpop.eup %1180 }
 0x794   :  { %v671_v42 = vpack.c.bf16 %v1181_v41, %v1181_v41 }
 0x796   :  { %1125 = vmatmul.mubr.bf16.vlgmr.msra.gmra.mrb[16].mxu1 %v671_v42 }
 0x869   :  { %v777_v0 = vpop.f32.mrb[16].mxu1 }
 0x86a   :  { %v778_v44 = vadd.f32 %v822_v43, %v777_v0  ;;  %v1126_v45 = vpop.f32.mrb[17].mxu1 }
 0x86b   :  { %v780_v23 = vpop.f32.mrb[18].mxu1 }
 0x86c   :  { %783 = vst [vmem:[#allocation11] sm:$0xff] %v778_v44  ;;  %v1127_v38 = vpop.f32.mrb[19].mxu1 }
 0x86d   :  { %1303 = shalt.err (!%p1300_p2)
}
 0x86e   :  { %s1304_s6 = scalar_lea.hbm %s1664_s7, 128 }
 0x86f   :  { %p1305_p3 = scmp.ne.s32.totalorder %s1664_s7, %s1304_s6  ;;  %p1308_p4 = scmp.lt.u32.totalorder %s1304_s6, %s1664_s7 }
 0x871   :  { %p1310_p5 = pnand %p1308_p4, %p1305_p3 }
 0x873   :  { %1313 = shalt.err (!%p1310_p5)
}
 0x874   :  { %793 = dma.vmem_to_hbm [thread:$0]  %s791_s14, 128, %s1664_s7, [#allocation4]  }
 0x875   :  { %1320 = dma.done.wait [#allocation4], 128  }
 0x876   :  { %1321 = vsyncadd [#allocation4], 4294967168 }
 0x877   :  { %797 = vsyncpa [#allocation3], 1 }
 0x878   :  { %798 = vsyncpa [#allocation6], 1 }
 0x879   :  { %799 = vsyncpa [#allocation9], 1 }
 0x87a   :  { %800 = vsyncpa [#allocation4], 1 }

</bundles_post_ra>
